<compile_context>
chip_gen: v5e
topology: v5e:2x2
jax: 0.10.0
libtpu: 0.0.40
codegen_flags: <defaults>
</compile_context>

<pallas_src>
import jax
import jax.numpy as jnp
from jax.experimental import pallas as pl
from jax.experimental.pallas import tpu as pltpu

LEAKY_SLOPE = 0.01   # F.leaky_relu default negative_slope
LANE = 128
SUBLANE = 8


def _leaky_relu(x):
    return jnp.where(x > 0, x, LEAKY_SLOPE * x)


def _round_up(n, m):
    return ((n + m - 1) // m) * m


def _pad2(a, rows, cols, dtype):
    out = jnp.zeros((rows, cols), dtype)
    return out.at[:a.shape[0], :a.shape[1]].set(a.astype(dtype))


# ----------------------------------------------------------------------------
# Parameter packing: per-model layer-1 weights + block-diagonal layer-2/3.
# ----------------------------------------------------------------------------
def pack_double_params(left_raw, right_raw):
    """Pack both models' params for the fused kernel.

    Returns (params, dims) where params =
      (w1l, w1r, b1l, b1r, w2, b2, w3, b3)
    w1l/w1r: per-model layer-1 weights, hidden dim lane-padded, bf16.
    w2:      block-diagonal (H1, H2) bf16 (left block top-left, right bottom-right).
    w3:      block-diagonal (H2, out_l+out_r) bf16 with *packed* (unpadded) output
             columns: left -> cols [0, out_l), right -> cols [out_l, out_l+out_r).
    Biases are f32, zero in padded positions.
    """
    (wl1, bl1, wl2, bl2, wl3, bl3) = left_raw
    (wr1, br1, wr2, br2, wr3, br3) = right_raw
    in_l, h1_l = wl1.shape
    h2_l, out_l = wl3.shape
    in_r, h1_r = wr1.shape
    h2_r, out_r = wr3.shape

    h1l_p, h2l_p = _round_up(h1_l, LANE), _round_up(h2_l, LANE)
    h1r_p, h2r_p = _round_up(h1_r, LANE), _round_up(h2_r, LANE)
    H1, H2, OUT = h1l_p + h1r_p, h2l_p + h2r_p, out_l + out_r

    w1l = _pad2(wl1, in_l, h1l_p, jnp.bfloat16)
    w1r = _pad2(wr1, in_r, h1r_p, jnp.bfloat16)
    b1l = _pad2(bl1.reshape(1, -1), 1, h1l_p, jnp.float32)
    b1r = _pad2(br1.reshape(1, -1), 1, h1r_p, jnp.float32)

    w2 = jnp.zeros((H1, H2), jnp.bfloat16)
    w2 = w2.at[:h1_l, :h2_l].set(wl2.astype(jnp.bfloat16))
    w2 = w2.at[h1l_p:h1l_p + h1_r, h2l_p:h2l_p + h2_r].set(wr2.astype(jnp.bfloat16))
    b2 = jnp.zeros((1, H2), jnp.float32)
    b2 = b2.at[0, :h2_l].set(bl2.reshape(-1).astype(jnp.float32))
    b2 = b2.at[0, h2l_p:h2l_p + h2_r].set(br2.reshape(-1).astype(jnp.float32))

    w3 = jnp.zeros((H2, OUT), jnp.bfloat16)
    w3 = w3.at[:h2_l, :out_l].set(wl3.astype(jnp.bfloat16))
    w3 = w3.at[h2l_p:h2l_p + h2_r, out_l:].set(wr3.astype(jnp.bfloat16))
    b3 = jnp.zeros((1, OUT), jnp.float32)
    b3 = b3.at[0, :out_l].set(bl3.reshape(-1).astype(jnp.float32))
    b3 = b3.at[0, out_l:].set(br3.reshape(-1).astype(jnp.float32))

    dims = dict(in_l=in_l, in_r=in_r, h1l_p=h1l_p, h1r_p=h1r_p,
                h2l_p=h2l_p, h2r_p=h2r_p, out_l=out_l, out_r=out_r)
    params = (w1l, w1r, b1l, b1r, w2, b2, w3, b3)
    return params, dims


# ----------------------------------------------------------------------------
# Fused DoubleNNet forward (single pallas_call; log_std is never produced).
# ----------------------------------------------------------------------------
def double_nnet_forward(left_x, right_x, packed_params, dims, *,
                        final_act_left=jnp.tanh, final_act_right=jnp.tanh,
                        block_batch=4096):
    w1l, w1r, b1l, b1r, w2, b2, w3, b3 = packed_params
    batch = left_x.shape[0]
    assert right_x.shape[0] == batch
    in_l, in_r = dims["in_l"], dims["in_r"]
    h1l_p = dims["h1l_p"]
    out_l, out_r = dims["out_l"], dims["out_r"]
    OUT = out_l + out_r
    H1, H2 = w2.shape

    # Batch tiling: 8-row aligned, tiles as large as block_batch, and >= 2 grid
    # steps whenever the batch allows so the "parallel" axis feeds both v7x TCs.
    bp8 = _round_up(batch, SUBLANE)
    num_tiles = max(pl.cdiv(bp8, block_batch), 2 if bp8 >= 2 * SUBLANE else 1)
    tb = _round_up(pl.cdiv(bp8, num_tiles), SUBLANE)
    batch_p = num_tiles * tb
    if batch_p != batch:
        left_x = jnp.pad(left_x, ((0, batch_p - batch), (0, 0)))
        right_x = jnp.pad(right_x, ((0, batch_p - batch), (0, 0)))

    def kernel(xl_ref, xr_ref, w1l_ref, w1r_ref, b1l_ref, b1r_ref,
               w2_ref, b2_ref, w3_ref, b3_ref, out_ref):
        # inputs: accept caller dtype; cast to bf16 for the MXU (no-op if already bf16)
        xl = xl_ref[...].astype(jnp.bfloat16)
        xr = xr_ref[...].astype(jnp.bfloat16)

        # layer 1 (per model, unpadded K): f32 accumulate + bias + leaky_relu
        h1l = _leaky_relu(
            jnp.dot(xl, w1l_ref[...], preferred_element_type=jnp.float32) + b1l_ref[...])
        h1r = _leaky_relu(
            jnp.dot(xr, w1r_ref[...], preferred_element_type=jnp.float32) + b1r_ref[...])

        # layer 2: block-diagonal (H1, H2) weight, K split per half (equivalent to a
        # lane-concat of h1l|h1r against the full W2; 256-wide N fills the MXU)
        h2 = (jnp.dot(h1l.astype(jnp.bfloat16), w2_ref[:h1l_p, :],
                      preferred_element_type=jnp.float32)
              + jnp.dot(h1r.astype(jnp.bfloat16), w2_ref[h1l_p:, :],
                        preferred_element_type=jnp.float32)
              + b2_ref[...])
        h2 = _leaky_relu(h2)

        # layer 3: packed narrow output (left cols [0,out_l), right cols [out_l,OUT))
        y = jnp.dot(h2.astype(jnp.bfloat16), w3_ref[...],
                    preferred_element_type=jnp.float32) + b3_ref[...]

        if final_act_left is final_act_right:
            out = final_act_left(y)
        else:
            col = jax.lax.broadcasted_iota(jnp.int32, y.shape, 1)
            out = jnp.where(col < out_l, final_act_left(y), final_act_right(y))
        out_ref[...] = out.astype(out_ref.dtype)

    def resident(shape):  # weights/biases: same block every grid step -> VMEM-resident
        return pl.BlockSpec(shape, lambda i: (0, 0))

    flops = 2 * batch_p * (in_l * h1l_p + in_r * (H1 - h1l_p) + H1 * H2 + H2 * OUT)
    bytes_accessed = (left_x.size * left_x.dtype.itemsize
                      + right_x.size * right_x.dtype.itemsize
                      + sum(int(p.size) * p.dtype.itemsize for p in packed_params)
                      + batch_p * OUT * 4)

    out = pl.pallas_call(
        kernel,
        out_shape=jax.ShapeDtypeStruct((batch_p, OUT), jnp.float32),
        grid=(num_tiles,),
        in_specs=[
            pl.BlockSpec((tb, in_l), lambda i: (i, 0)),   # left input, tiled over batch
            pl.BlockSpec((tb, in_r), lambda i: (i, 0)),   # right input
            resident(w1l.shape), resident(w1r.shape),
            resident(b1l.shape), resident(b1r.shape),
            resident(w2.shape), resident(b2.shape),
            resident(w3.shape), resident(b3.shape),
        ],
        out_specs=pl.BlockSpec((tb, OUT), lambda i: (i, 0)),
        compiler_params=pltpu.CompilerParams(
            dimension_semantics=("parallel",),
            vmem_limit_bytes=32 * 1024 * 1024),
        cost_estimate=pl.CostEstimate(
            flops=flops,
            transcendentals=batch_p * OUT,
            bytes_accessed=bytes_accessed),
    )(left_x, right_x, w1l, w1r, b1l, b1r, w2, b2, w3, b3)

    # Only the (tiny, <= OUT-wide) left/right column split remains; the old
    # (batch_p, 128) f32 slice re-pass is gone because the kernel output is packed.
    if batch_p != batch:
        out = out[:batch]
    return out[:, :out_l], out[:, out_l:]


# ----------------------------------------------------------------------------
# Init + pure-JAX reference for validation.
# ----------------------------------------------------------------------------
def init_params(key, dims):
    """Mimic torch.nn.Linear default init: U(-1/sqrt(fan_in), 1/sqrt(fan_in))."""
    params = []
    for i in range(len(dims) - 1):
        fan_in, fan_out = dims[i], dims[i + 1]
        key, kw, kb = jax.random.split(key, 3)
        bound = 1.0 / jnp.sqrt(fan_in)
        w = jax.random.uniform(kw, (fan_in, fan_out), jnp.float32, -bound, bound)
        b = jax.random.uniform(kb, (1, fan_out), jnp.float32, -bound, bound)
        params.extend([w, b])
    return tuple(params)


def nnet_reference(x, raw_params, act=jnp.tanh):
    w1, b1, w2, b2, w3, b3 = raw_params
    h = _leaky_relu(x @ w1 + b1)
    h = _leaky_relu(h @ w2 + b2)
    return act(h @ w3 + b3)


# TODO(synk): ProbabilisticNet.get_log_prob / sample (Normal distribution sampling
# and log_std handling) are not part of DoubleNNet.forward and are left to plain JAX.

if __name__ == "__main__":
    key = jax.random.PRNGKey(0)
    batch = 2
    # left model: 32 -> [64, 64] -> 8 ; right model: 16 -> [64, 64] -> 4
    left_dims = [32, 64, 64, 8]
    right_dims = [16, 64, 64, 4]

    key, kxl, kxr, kpl_, kpr = jax.random.split(key, 5)
    left_x = jax.random.normal(kxl, (batch, left_dims[0]), jnp.float32)
    right_x = jax.random.normal(kxr, (batch, right_dims[0]), jnp.float32)
    left_raw = init_params(kpl_, left_dims)
    right_raw = init_params(kpr, right_dims)

    packed, dims = pack_double_params(left_raw, right_raw)

    left_out, right_out = double_nnet_forward(left_x, right_x, packed, dims)
    jax.block_until_ready((left_out, right_out))

    ref_l = nnet_reference(left_x, left_raw)
    ref_r = nnet_reference(right_x, right_raw)

    assert left_out.shape == (batch, left_dims[-1])
    assert right_out.shape == (batch, right_dims[-1])
    # bf16 matmul inputs -> loosened tolerance vs the f32 reference.
    assert jnp.allclose(left_out, ref_l, atol=5e-2), "left output mismatch"
    assert jnp.allclose(right_out, ref_r, atol=5e-2), "right output mismatch"

    print("KERNEL_OK")
</pallas_src>

<mosaic_0001>
module attributes {stable_mosaic.version = 11 : i64} {
  func.func @kernel(%arg0: i32, %arg1: memref<8x32xf32, #tpu.memory_space<vmem>>, %arg2: memref<8x16xf32, #tpu.memory_space<vmem>>, %arg3: memref<32x128xbf16, #tpu.memory_space<vmem>>, %arg4: memref<16x128xbf16, #tpu.memory_space<vmem>>, %arg5: memref<1x128xf32, #tpu.memory_space<vmem>>, %arg6: memref<1x128xf32, #tpu.memory_space<vmem>>, %arg7: memref<256x256xbf16, #tpu.memory_space<vmem>>, %arg8: memref<1x256xf32, #tpu.memory_space<vmem>>, %arg9: memref<256x12xbf16, #tpu.memory_space<vmem>>, %arg10: memref<1x12xf32, #tpu.memory_space<vmem>>, %arg11: memref<8x12xf32, #tpu.memory_space<vmem>>) attributes {dimension_semantics = [#tpu.dimension_semantics<parallel>], iteration_bounds = array<i64: 1>, scalar_prefetch = 0 : i64, scratch_operands = 0 : i64, tpu.core_type = #tpu.core_type<tc>, window_params = [{transform_indices = @transform_0, window_bounds = array<i64: 8, 32>}, {transform_indices = @transform_1, window_bounds = array<i64: 8, 16>}, {pipeline_mode = #tpu.pipeline_mode<synchronous>, transform_indices = @transform_2, window_bounds = array<i64: 32, 128>}, {pipeline_mode = #tpu.pipeline_mode<synchronous>, transform_indices = @transform_3, window_bounds = array<i64: 16, 128>}, {pipeline_mode = #tpu.pipeline_mode<synchronous>, transform_indices = @transform_4, window_bounds = array<i64: 1, 128>}, {pipeline_mode = #tpu.pipeline_mode<synchronous>, transform_indices = @transform_5, window_bounds = array<i64: 1, 128>}, {pipeline_mode = #tpu.pipeline_mode<synchronous>, transform_indices = @transform_6, window_bounds = array<i64: 256, 256>}, {pipeline_mode = #tpu.pipeline_mode<synchronous>, transform_indices = @transform_7, window_bounds = array<i64: 1, 256>}, {pipeline_mode = #tpu.pipeline_mode<synchronous>, transform_indices = @transform_8, window_bounds = array<i64: 256, 12>}, {pipeline_mode = #tpu.pipeline_mode<synchronous>, transform_indices = @transform_9, window_bounds = array<i64: 1, 12>}, {transform_indices = @transform_10, window_bounds = array<i64: 8, 12>}]} {
    %c0 = arith.constant 0 : index
    %c0_0 = arith.constant 0 : index
    %0 = vector.load %arg1[%c0, %c0_0] : memref<8x32xf32, #tpu.memory_space<vmem>>, vector<8x32xf32>
    %1 = arith.truncf %0 : vector<8x32xf32> to vector<8x32xbf16>
    %c0_1 = arith.constant 0 : index
    %c0_2 = arith.constant 0 : index
    %2 = vector.load %arg2[%c0_1, %c0_2] : memref<8x16xf32, #tpu.memory_space<vmem>>, vector<8x16xf32>
    %3 = arith.truncf %2 : vector<8x16xf32> to vector<8x16xbf16>
    %c0_3 = arith.constant 0 : index
    %c0_4 = arith.constant 0 : index
    %4 = vector.load %arg3[%c0_3, %c0_4] : memref<32x128xbf16, #tpu.memory_space<vmem>>, vector<32x128xbf16>
    %cst = arith.constant dense<0.000000e+00> : vector<8x128xf32>
    %5 = tpu.matmul %1, %4, %cst {dimension_numbers = #tpu.dot_dimension_numbers<[1], [0], [0], [1], [0, 0, 1, 1], [], []>} : vector<8x32xbf16>, vector<32x128xbf16>, vector<8x128xf32> -> vector<8x128xf32>
    %c0_5 = arith.constant 0 : index
    %c0_6 = arith.constant 0 : index
    %6 = vector.load %arg5[%c0_5, %c0_6] : memref<1x128xf32, #tpu.memory_space<vmem>>, vector<1x128xf32>
    %7 = vector.broadcast %6 : vector<1x128xf32> to vector<8x128xf32>
    %8 = arith.addf %5, %7 : vector<8x128xf32>
    %cst_7 = arith.constant 0.000000e+00 : f32
    %9 = vector.broadcast %cst_7 : f32 to vector<8x128xf32>
    %10 = arith.cmpf ogt, %8, %9 : vector<8x128xf32>
    %cst_8 = arith.constant 0.00999999977 : f32
    %11 = vector.broadcast %cst_8 : f32 to vector<8x128xf32>
    %12 = arith.mulf %11, %8 : vector<8x128xf32>
    %13 = arith.select %10, %8, %12 : vector<8x128xi1>, vector<8x128xf32>
    %c0_9 = arith.constant 0 : index
    %c0_10 = arith.constant 0 : index
    %14 = vector.load %arg4[%c0_9, %c0_10] : memref<16x128xbf16, #tpu.memory_space<vmem>>, vector<16x128xbf16>
    %cst_11 = arith.constant dense<0.000000e+00> : vector<8x128xf32>
    %15 = tpu.matmul %3, %14, %cst_11 {dimension_numbers = #tpu.dot_dimension_numbers<[1], [0], [0], [1], [0, 0, 1, 1], [], []>} : vector<8x16xbf16>, vector<16x128xbf16>, vector<8x128xf32> -> vector<8x128xf32>
    %c0_12 = arith.constant 0 : index
    %c0_13 = arith.constant 0 : index
    %16 = vector.load %arg6[%c0_12, %c0_13] : memref<1x128xf32, #tpu.memory_space<vmem>>, vector<1x128xf32>
    %17 = vector.broadcast %16 : vector<1x128xf32> to vector<8x128xf32>
    %18 = arith.addf %15, %17 : vector<8x128xf32>
    %cst_14 = arith.constant 0.000000e+00 : f32
    %19 = vector.broadcast %cst_14 : f32 to vector<8x128xf32>
    %20 = arith.cmpf ogt, %18, %19 : vector<8x128xf32>
    %cst_15 = arith.constant 0.00999999977 : f32
    %21 = vector.broadcast %cst_15 : f32 to vector<8x128xf32>
    %22 = arith.mulf %21, %18 : vector<8x128xf32>
    %23 = arith.select %20, %18, %22 : vector<8x128xi1>, vector<8x128xf32>
    %24 = arith.truncf %13 : vector<8x128xf32> to vector<8x128xbf16>
    %c0_16 = arith.constant 0 : index
    %c0_17 = arith.constant 0 : index
    %25 = vector.load %arg7[%c0_16, %c0_17] : memref<256x256xbf16, #tpu.memory_space<vmem>>, vector<128x256xbf16>
    %cst_18 = arith.constant dense<0.000000e+00> : vector<8x256xf32>
    %26 = tpu.matmul %24, %25, %cst_18 {dimension_numbers = #tpu.dot_dimension_numbers<[1], [0], [0], [1], [0, 0, 1, 1], [], []>} : vector<8x128xbf16>, vector<128x256xbf16>, vector<8x256xf32> -> vector<8x256xf32>
    %27 = arith.truncf %23 : vector<8x128xf32> to vector<8x128xbf16>
    %c128 = arith.constant 128 : index
    %c0_19 = arith.constant 0 : index
    %28 = vector.load %arg7[%c128, %c0_19] : memref<256x256xbf16, #tpu.memory_space<vmem>>, vector<128x256xbf16>
    %cst_20 = arith.constant dense<0.000000e+00> : vector<8x256xf32>
    %29 = tpu.matmul %27, %28, %cst_20 {dimension_numbers = #tpu.dot_dimension_numbers<[1], [0], [0], [1], [0, 0, 1, 1], [], []>} : vector<8x128xbf16>, vector<128x256xbf16>, vector<8x256xf32> -> vector<8x256xf32>
    %30 = arith.addf %26, %29 : vector<8x256xf32>
    %c0_21 = arith.constant 0 : index
    %c0_22 = arith.constant 0 : index
    %31 = vector.load %arg8[%c0_21, %c0_22] : memref<1x256xf32, #tpu.memory_space<vmem>>, vector<1x256xf32>
    %32 = vector.broadcast %31 : vector<1x256xf32> to vector<8x256xf32>
    %33 = arith.addf %30, %32 : vector<8x256xf32>
    %cst_23 = arith.constant 0.000000e+00 : f32
    %34 = vector.broadcast %cst_23 : f32 to vector<8x256xf32>
    %35 = arith.cmpf ogt, %33, %34 : vector<8x256xf32>
    %cst_24 = arith.constant 0.00999999977 : f32
    %36 = vector.broadcast %cst_24 : f32 to vector<8x256xf32>
    %37 = arith.mulf %36, %33 : vector<8x256xf32>
    %38 = arith.select %35, %33, %37 : vector<8x256xi1>, vector<8x256xf32>
    %39 = arith.truncf %38 : vector<8x256xf32> to vector<8x256xbf16>
    %c0_25 = arith.constant 0 : index
    %c0_26 = arith.constant 0 : index
    %40 = vector.load %arg9[%c0_25, %c0_26] : memref<256x12xbf16, #tpu.memory_space<vmem>>, vector<256x12xbf16>
    %cst_27 = arith.constant dense<0.000000e+00> : vector<8x12xf32>
    %41 = tpu.matmul %39, %40, %cst_27 {dimension_numbers = #tpu.dot_dimension_numbers<[1], [0], [0], [1], [0, 0, 1, 1], [], []>} : vector<8x256xbf16>, vector<256x12xbf16>, vector<8x12xf32> -> vector<8x12xf32>
    %c0_28 = arith.constant 0 : index
    %c0_29 = arith.constant 0 : index
    %42 = vector.load %arg10[%c0_28, %c0_29] : memref<1x12xf32, #tpu.memory_space<vmem>>, vector<1x12xf32>
    %43 = vector.broadcast %42 : vector<1x12xf32> to vector<8x12xf32>
    %44 = arith.addf %41, %43 : vector<8x12xf32>
    %45 = math.tanh %44 : vector<8x12xf32>
    %c0_30 = arith.constant 0 : index
    %c0_31 = arith.constant 0 : index
    %46 = vector.load %arg11[%c0_30, %c0_31] : memref<8x12xf32, #tpu.memory_space<vmem>>, vector<8x12xf32>
    tpu.vector_store %arg11[%c0_30, %c0_31], %45 {strides = array<i32>} : memref<8x12xf32, #tpu.memory_space<vmem>>, vector<8x12xf32>,
    return
  }
  func.func @transform_0(%arg0: i32) -> (i32, i32) {
    %c0_i32 = arith.constant 0 : i32
    %c0_i32_0 = arith.constant 0 : i32
    return %arg0, %c0_i32 : i32, i32
  }
  func.func @transform_1(%arg0: i32) -> (i32, i32) {
    %c0_i32 = arith.constant 0 : i32
    %c0_i32_0 = arith.constant 0 : i32
    return %arg0, %c0_i32 : i32, i32
  }
  func.func @transform_2(%arg0: i32) -> (i32, i32) {
    %c0_i32 = arith.constant 0 : i32
    %c0_i32_0 = arith.constant 0 : i32
    %c0_i32_1 = arith.constant 0 : i32
    return %c0_i32, %c0_i32_0 : i32, i32
  }
  func.func @transform_3(%arg0: i32) -> (i32, i32) {
    %c0_i32 = arith.constant 0 : i32
    %c0_i32_0 = arith.constant 0 : i32
    %c0_i32_1 = arith.constant 0 : i32
    return %c0_i32, %c0_i32_0 : i32, i32
  }
  func.func @transform_4(%arg0: i32) -> (i32, i32) {
    %c0_i32 = arith.constant 0 : i32
    %c0_i32_0 = arith.constant 0 : i32
    %c0_i32_1 = arith.constant 0 : i32
    return %c0_i32, %c0_i32_0 : i32, i32
  }
  func.func @transform_5(%arg0: i32) -> (i32, i32) {
    %c0_i32 = arith.constant 0 : i32
    %c0_i32_0 = arith.constant 0 : i32
    %c0_i32_1 = arith.constant 0 : i32
    return %c0_i32, %c0_i32_0 : i32, i32
  }
  func.func @transform_6(%arg0: i32) -> (i32, i32) {
    %c0_i32 = arith.constant 0 : i32
    %c0_i32_0 = arith.constant 0 : i32
    %c0_i32_1 = arith.constant 0 : i32
    return %c0_i32, %c0_i32_0 : i32, i32
  }
  func.func @transform_7(%arg0: i32) -> (i32, i32) {
    %c0_i32 = arith.constant 0 : i32
    %c0_i32_0 = arith.constant 0 : i32
    %c0_i32_1 = arith.constant 0 : i32
    return %c0_i32, %c0_i32_0 : i32, i32
  }
  func.func @transform_8(%arg0: i32) -> (i32, i32) {
    %c0_i32 = arith.constant 0 : i32
    %c0_i32_0 = arith.constant 0 : i32
    %c0_i32_1 = arith.constant 0 : i32
    return %c0_i32, %c0_i32_0 : i32, i32
  }
  func.func @transform_9(%arg0: i32) -> (i32, i32) {
    %c0_i32 = arith.constant 0 : i32
    %c0_i32_0 = arith.constant 0 : i32
    %c0_i32_1 = arith.constant 0 : i32
    return %c0_i32, %c0_i32_0 : i32, i32
  }
  func.func @transform_10(%arg0: i32) -> (i32, i32) {
    %c0_i32 = arith.constant 0 : i32
    %c0_i32_0 = arith.constant 0 : i32
    return %arg0, %c0_i32 : i32, i32
  }
}

</mosaic_0001>

<bundles_post_ra>
// kernel: tpu_custom_call.1
= control target key start
LH: loop header
LB: loop body
LE: loop exit
PB: predicated region body
PF: predicated region fallthrough
CT: control target
= control target key end

     0   :  { %15 = vsyncpa [#allocation3], 0  ;;  %s1029_s0 = inlined_call_operand.vmem [shape: f32[8,32], index: 0, kind: input, shape index: {}]   ;;  %s1030_s1 = inlined_call_operand.vmem [shape: f32[8,16], index: 1, kind: input, shape index: {}]   ;;  %s1031_s2 = inlined_call_operand.vmem [shape: bf16[32,128], index: 2, kind: input, shape index: {}]   ;;  %s1032_s3 = inlined_call_operand.vmem [shape: bf16[16,128], index: 3, kind: input, shape index: {}]   ;;  %s1033_s4 = inlined_call_operand.vmem [shape: f32[1,128], index: 4, kind: input, shape index: {}]   ;;  %s1034_s5 = inlined_call_operand.vmem [shape: f32[1,128], index: 5, kind: input, shape index: {}]   ;;  %s1035_s6 = inlined_call_operand.hbm [shape: bf16[256,256], index: 6, kind: input, shape index: {}]   ;;  %s1036_s7 = inlined_call_operand.vmem [shape: f32[1,256], index: 7, kind: input, shape index: {}]   ;;  %s1037_s8 = inlined_call_operand.vmem [shape: bf16[256,12], index: 8, kind: input, shape index: {}]   ;;  %s1038_s9 = inlined_call_operand.vmem [shape: f32[1,12], index: 9, kind: input, shape index: {}]   ;;  %s1039_s10 = inlined_call_operand.hbm [shape: f32[8,12], index: 10, kind: output, shape index: {}]  }
   0x1   :  { %16 = vsyncpa [#allocation4], 0  ;;  %s33_s15 = sshll.u32 %s1035_s6, 4  ;;  %s887_s16 = smov [#allocation2]   ;;  %s34_s15 = int_to_ptr.hbm [resolvable:$true] %s33_s15 }
   0x2   :  { %s35_s17 = sshll.u32 %s887_s16, 4  ;;  %s888_s18 = smov 128   ;;  %s36_s17 = int_to_ptr.vmem [resolvable:$true] %s35_s17 }
   0x3   :  { %s889_s19 = smov 8  }
   0x4   :  { %41 = dma.hbm_to_vmem [thread:$0]  %s34_s15, 4096, %s36_s17, [#allocation3], %s888_s18, %s888_s18, %s889_s19  }
   0x5   :  { %883 = dma.done.wait [#allocation3], 4096  }
   0x6   :  { %884 = vsyncadd [#allocation3], 4294963200  ;;  %v776_v0 = vld [vmem:[%s1031_s2 + $0x8] sm:$0xff]  ;;  %v777_v1 = vld [vmem:[%s1032_s3] sm:$0xff]  ;;  %vm109_vm0 = vcmask 130048   ;;  %vm77_vm1 = vcmask 261120  }
   0x7   :  { %v55_v2 = vld [vmem:[%s1030_s1] sm:$0xff]  ;;  %v641_v6 = vld [vmem:[#allocation2 + $0xf0] sm:$0xf]  ;;  %87 = vmatpush.bf16.msra.mxu0 %v776_v0  ;;  %120 = vmatpush.bf16.msra.mxu1 %v777_v1  ;;  %v809_v7 = vld [vmem:[#allocation2 + $0xf4] sm:$0xf0]  ;;  %s890_s16 = smov [#allocation5]  }
   0x8   :  { %v56_v3 = vpack.c.bf16 %v55_v2, %v55_v2  ;;  %v775_v4 = vld [vmem:[%s1031_s2] sm:$0xff]  ;;  %v808_v8 = vld [vmem:[#allocation2 + $0xf4] sm:$0xf]  ;;  %v643_v9 = vld [vmem:[#allocation2 + $0xf8] sm:$0xf0]  ;;  %v642_v10 = vor.u32 %v809_v7, %v641_v6  ;;  %s557_s17 = sshll.u32 %s890_s16, 4  ;;  %s558_s17 = int_to_ptr.vmem [resolvable:$true] %s557_s17 }
   0x9   :  { %v53_v5 = vld [vmem:[%s1029_s0] sm:$0xff]  ;;  %v646_v11 = vor.u32 %v808_v8, %v643_v9  ;;  %v807_v13 = vld [vmem:[#allocation2 + $0xe4] sm:$0xf0]  ;;  %v635_v15 = vld [vmem:[#allocation2 + $0xe8] sm:$0xf0]  ;;  %s559_s20 = sshll.u32 %s1039_s10, 4  ;;  %s560_s20 = int_to_ptr.hbm [resolvable:$true] %s559_s20 }
   0xa   :  { %v633_v12 = vld [vmem:[#allocation2 + $0xe0] sm:$0xf]  ;;  %v806_v14 = vld [vmem:[#allocation2 + $0xe4] sm:$0xf]  ;;  %v705_v16 = vld [vmem:[#allocation2 + $0x70] sm:$0xf]  ;;  %582 = vmatmul.msk.bf16.vlgmr.msra.gmra.mxu1 %vm109_vm0, %v56_v3  ;;  %v54_v18 = vpack.c.bf16 %v53_v5, %v53_v5  ;;  %243 = vmatpush.bf16.msra.mxu2 %v642_v10 }
   0xb   :  { %v793_v17 = vld [vmem:[#allocation2 + $0x74] sm:$0xf0]  ;;  %v634_v19 = vor.u32 %v807_v13, %v633_v12  ;;  %v792_v21 = vld [vmem:[#allocation2 + $0x74] sm:$0xf]  ;;  %v707_v22 = vld [vmem:[#allocation2 + $0x78] sm:$0xf0]  ;;  %88 = vmatpush.bf16.msra.mxu0 %v775_v4  ;;  %256 = vmatpush.bf16.msra.mxu3 %v646_v11  ;;  %v638_v24 = vor.u32 %v806_v14, %v635_v15 }
   0xc   :  { %v706_v20 = vor.u32 %v793_v17, %v705_v16  ;;  %v625_v23 = vld [vmem:[#allocation2 + $0xd0] sm:$0xf]  ;;  %v710_v25 = vor.u32 %v792_v21, %v707_v22  ;;  %v805_v26 = vld [vmem:[#allocation2 + $0xd4] sm:$0xf0]  ;;  %v804_v27 = vld [vmem:[#allocation2 + $0xd4] sm:$0xf] }
   0xd   :  { %v627_v28 = vld [vmem:[#allocation2 + $0xd8] sm:$0xf0]  ;;  %v697_v29 = vld [vmem:[#allocation2 + $0x60] sm:$0xf]  ;;  %v791_v30 = vld [vmem:[#allocation2 + $0x64] sm:$0xf0]  ;;  %v626_v34 = vor.u32 %v805_v26, %v625_v23 }
   0xe   :  { %349 = vmatpush.bf16.msrb.mxu1 %v706_v20  ;;  %v790_v31 = vld [vmem:[#allocation2 + $0x64] sm:$0xf]  ;;  %v698_v32 = vor.u32 %v791_v30, %v697_v29  ;;  %v699_v33 = vld [vmem:[#allocation2 + $0x68] sm:$0xf0]  ;;  %577 = vmatmul.msk.bf16.vlgmr.msra.gmra.mxu0 %vm77_vm1, %v54_v18  ;;  %v617_v36 = vld [vmem:[#allocation2 + $0xc0] sm:$0xf]  ;;  %v630_v39 = vor.u32 %v804_v27, %v627_v28 }
   0xf   :  { %362 = vmatpush.bf16.msrb.mxu0 %v710_v25  ;;  %244 = vmatpush.bf16.msra.mxu2 %v634_v19  ;;  %v702_v35 = vor.u32 %v790_v31, %v699_v33  ;;  %v803_v37 = vld [vmem:[#allocation2 + $0xc4] sm:$0xf0]  ;;  %v689_v38 = vld [vmem:[#allocation2 + $0x50] sm:$0xf]  ;;  %v789_v40 = vld [vmem:[#allocation2 + $0x54] sm:$0xf0] }
  0x10   :  { %257 = vmatpush.bf16.msra.mxu3 %v638_v24  ;;  %v788_v41 = vld [vmem:[#allocation2 + $0x54] sm:$0xf]  ;;  %v691_v42 = vld [vmem:[#allocation2 + $0x58] sm:$0xf0]  ;;  %v802_v43 = vld [vmem:[#allocation2 + $0xc4] sm:$0xf]  ;;  %v690_v45 = vor.u32 %v789_v40, %v689_v38  ;;  %v618_v49 = vor.u32 %v803_v37, %v617_v36 }
  0x11   :  { %v619_v44 = vld [vmem:[#allocation2 + $0xc8] sm:$0xf0]  ;;  %v694_v46 = vor.u32 %v788_v41, %v691_v42  ;;  %v681_v47 = vld [vmem:[#allocation2 + $0x40] sm:$0xf]  ;;  %v787_v48 = vld [vmem:[#allocation2 + $0x44] sm:$0xf0] }
  0x12   :  { %350 = vmatpush.bf16.msrb.mxu1 %v698_v32  ;;  %v786_v50 = vld [vmem:[#allocation2 + $0x44] sm:$0xf]  ;;  %v683_v51 = vld [vmem:[#allocation2 + $0x48] sm:$0xf0]  ;;  %v622_v52 = vor.u32 %v802_v43, %v619_v44  ;;  %v609_v53 = vld [vmem:[#allocation2 + $0xb0] sm:$0xf]  ;;  %v682_v57 = vor.u32 %v787_v48, %v681_v47 }
  0x13   :  { %363 = vmatpush.bf16.msrb.mxu0 %v702_v35  ;;  %245 = vmatpush.bf16.msra.mxu2 %v626_v34  ;;  %v801_v54 = vld [vmem:[#allocation2 + $0xb4] sm:$0xf0]  ;;  %v800_v55 = vld [vmem:[#allocation2 + $0xb4] sm:$0xf]  ;;  %v611_v56 = vld [vmem:[#allocation2 + $0xb8] sm:$0xf0]  ;;  %v686_v59 = vor.u32 %v786_v50, %v683_v51 }
  0x14   :  { %258 = vmatpush.bf16.msra.mxu3 %v630_v39  ;;  %v673_v58 = vld [vmem:[#allocation2 + $0x30] sm:$0xf]  ;;  %v785_v60 = vld [vmem:[#allocation2 + $0x34] sm:$0xf0]  ;;  %v784_v61 = vld [vmem:[#allocation2 + $0x34] sm:$0xf]  ;;  %v610_v62 = vor.u32 %v801_v54, %v609_v53  ;;  %v614_v0 = vor.u32 %v800_v55, %v611_v56 }
  0x15   :  { %v675_v63 = vld [vmem:[#allocation2 + $0x38] sm:$0xf0]  ;;  %v601_v1 = vld [vmem:[#allocation2 + $0xa0] sm:$0xf]  ;;  %v799_v2 = vld [vmem:[#allocation2 + $0xa4] sm:$0xf0]  ;;  %v674_v5 = vor.u32 %v785_v60, %v673_v58 }
  0x16   :  { %351 = vmatpush.bf16.msrb.mxu1 %v690_v45  ;;  %v798_v3 = vld [vmem:[#allocation2 + $0xa4] sm:$0xf]  ;;  %v603_v4 = vld [vmem:[#allocation2 + $0xa8] sm:$0xf0]  ;;  %v678_v6 = vor.u32 %v784_v61, %v675_v63  ;;  %v602_v7 = vor.u32 %v799_v2, %v601_v1  ;;  %v593_v9 = vld [vmem:[#allocation2 + $0x90] sm:$0xf] }
  0x17   :  { %364 = vmatpush.bf16.msrb.mxu0 %v694_v46  ;;  %246 = vmatpush.bf16.msra.mxu2 %v618_v49  ;;  %v606_v8 = vor.u32 %v798_v3, %v603_v4  ;;  %v797_v10 = vld [vmem:[#allocation2 + $0x94] sm:$0xf0]  ;;  %v796_v11 = vld [vmem:[#allocation2 + $0x94] sm:$0xf]  ;;  %v595_v13 = vld [vmem:[#allocation2 + $0x98] sm:$0xf0] }
  0x18   :  { %259 = vmatpush.bf16.msra.mxu3 %v622_v52  ;;  %v594_v12 = vor.u32 %v797_v10, %v593_v9  ;;  %v665_v14 = vld [vmem:[#allocation2 + $0x20] sm:$0xf]  ;;  %v783_v15 = vld [vmem:[#allocation2 + $0x24] sm:$0xf0]  ;;  %v598_v16 = vor.u32 %v796_v11, %v595_v13  ;;  %v782_v18 = vld [vmem:[#allocation2 + $0x24] sm:$0xf] }
  0x19   :  { %v666_v17 = vor.u32 %v783_v15, %v665_v14  ;;  %v667_v19 = vld [vmem:[#allocation2 + $0x28] sm:$0xf0]  ;;  %v585_v21 = vld [vmem:[#allocation2 + $0x80] sm:$0xf]  ;;  %v795_v22 = vld [vmem:[#allocation2 + $0x84] sm:$0xf0] }
  0x1a   :  { %352 = vmatpush.bf16.msrb.mxu1 %v682_v57  ;;  %v670_v20 = vor.u32 %v782_v18, %v667_v19  ;;  %v794_v23 = vld [vmem:[#allocation2 + $0x84] sm:$0xf]  ;;  %v586_v24 = vor.u32 %v795_v22, %v585_v21  ;;  %v587_v25 = vld [vmem:[#allocation2 + $0x88] sm:$0xf0]  ;;  %v657_v26 = vld [vmem:[#allocation2 + $0x10] sm:$0xf] }
  0x1b   :  { %365 = vmatpush.bf16.msrb.mxu0 %v686_v59  ;;  %247 = vmatpush.bf16.msra.mxu2 %v610_v62  ;;  %v590_v27 = vor.u32 %v794_v23, %v587_v25  ;;  %v781_v28 = vld [vmem:[#allocation2 + $0x14] sm:$0xf0]  ;;  %v780_v29 = vld [vmem:[#allocation2 + $0x14] sm:$0xf]  ;;  %v659_v30 = vld [vmem:[#allocation2 + $0x18] sm:$0xf0] }
  0x1c   :  { %260 = vmatpush.bf16.msra.mxu3 %v614_v0  ;;  %v658_v31 = vor.u32 %v781_v28, %v657_v26  ;;  %v662_v32 = vor.u32 %v780_v29, %v659_v30  ;;  %v649_v33 = vld [vmem:[#allocation2] sm:$0xf]  ;;  %v779_v34 = vld [vmem:[#allocation2 + $0x4] sm:$0xf0]  ;;  %v778_v35 = vld [vmem:[#allocation2 + $0x4] sm:$0xf] }
  0x1d   :  { %v650_v36 = vor.u32 %v779_v34, %v649_v33  ;;  %v651_v37 = vld [vmem:[#allocation2 + $0x8] sm:$0xf0]  ;;  %v817_v39 = vld [vmem:[%s1037_s8 + $0x38] sm:$0xff]  ;;  %v816_v41 = vld [vmem:[%s1037_s8 + $0x30] sm:$0xff]  ;;  %vm550_vm6 = vcmask 97280  }
  0x1e   :  { %353 = vmatpush.bf16.msrb.mxu1 %v674_v5  ;;  %v654_v38 = vor.u32 %v778_v35, %v651_v37  ;;  %v825_v40 = vld [vmem:[%s1037_s8 + $0x78] sm:$0xff]  ;;  %v824_v42 = vld [vmem:[%s1037_s8 + $0x70] sm:$0xff]  ;;  %v815_v43 = vld [vmem:[%s1037_s8 + $0x28] sm:$0xff] }
  0x1f   :  { %366 = vmatpush.bf16.msrb.mxu0 %v678_v6  ;;  %248 = vmatpush.bf16.msra.mxu2 %v602_v7  ;;  %v823_v44 = vld [vmem:[%s1037_s8 + $0x68] sm:$0xff]  ;;  %v814_v45 = vld [vmem:[%s1037_s8 + $0x20] sm:$0xff]  ;;  %v813_v47 = vld [vmem:[%s1037_s8 + $0x18] sm:$0xff] }
  0x20   :  { %261 = vmatpush.bf16.msra.mxu3 %v606_v8  ;;  %v822_v46 = vld [vmem:[%s1037_s8 + $0x60] sm:$0xff]  ;;  %v821_v48 = vld [vmem:[%s1037_s8 + $0x58] sm:$0xff]  ;;  %v812_v63 = vld [vmem:[%s1037_s8 + $0x10] sm:$0xff] }
  0x21   :  { %v830_v49 = vld [vmem:[%s1034_s5] ss:$0 sm:$0xff]  ;;  %v820_v0 = vld [vmem:[%s1037_s8 + $0x50] sm:$0xff]  ;;  %v811_v1 = vld [vmem:[%s1037_s8 + $0x8] sm:$0xff] }
  0x22   :  { %354 = vmatpush.bf16.msrb.mxu1 %v666_v17  ;;  %v831_v52 = vld [vmem:[%s1033_s4] ss:$0 sm:$0xff]  ;;  %v819_v2 = vld [vmem:[%s1037_s8 + $0x48] sm:$0xff] }
  0x23   :  { %249 = vmatpush.bf16.msra.mxu2 %v594_v12  ;;  %367 = vmatpush.bf16.msrb.mxu0 %v670_v20  ;;  %v810_v3 = vld [vmem:[%s1037_s8] sm:$0xff] }
  0x24   :  { %262 = vmatpush.bf16.msra.mxu3 %v598_v16  ;;  %v818_v4 = vld [vmem:[%s1037_s8 + $0x40] sm:$0xff] }
  0x25   :  { %v375_v5 = vld [vmem:[%s1036_s7] sm:$0x3] }
  0x26   :  { %355 = vmatpush.bf16.msrb.mxu1 %v658_v31  ;;  %v377_v8 = vperm.slane %v375_v5, 0  ;;  %v378_v9 = vperm.slane %v375_v5, 1  ;;  %v832_v26 = vld [vmem:[%s1038_s9] ss:$0 sm:$0xff] }
  0x27   :  { %250 = vmatpush.bf16.msra.mxu2 %v586_v24  ;;  %368 = vmatpush.bf16.msrb.mxu0 %v662_v32 }
  0x28   :  { %263 = vmatpush.bf16.msra.mxu3 %v590_v27 }
  0x2a   :  { %356 = vmatpush.bf16.msrb.mxu1 %v650_v36 }
  0x2b   :  { %369 = vmatpush.bf16.msrb.mxu0 %v654_v38  ;;  %523 = vmatpush.bf16.msrb.mxu2 %v817_v39 }
  0x2c   :  { %536 = vmatpush.bf16.msrb.mxu3 %v825_v40 }
  0x2f   :  { %524 = vmatpush.bf16.msrb.mxu2 %v816_v41 }
  0x30   :  { %537 = vmatpush.bf16.msrb.mxu3 %v824_v42 }
  0x33   :  { %525 = vmatpush.bf16.msrb.mxu2 %v815_v43 }
  0x34   :  { %538 = vmatpush.bf16.msrb.mxu3 %v823_v44 }
  0x37   :  { %526 = vmatpush.bf16.msrb.mxu2 %v814_v45 }
  0x38   :  { %539 = vmatpush.bf16.msrb.mxu3 %v822_v46 }
  0x3b   :  { %527 = vmatpush.bf16.msrb.mxu2 %v813_v47 }
  0x3c   :  { %540 = vmatpush.bf16.msrb.mxu3 %v821_v48 }
  0x3f   :  { %528 = vmatpush.bf16.msrb.mxu2 %v812_v63 }
  0x40   :  { %541 = vmatpush.bf16.msrb.mxu3 %v820_v0 }
  0x43   :  { %529 = vmatpush.bf16.msrb.mxu2 %v811_v1 }
  0x44   :  { %542 = vmatpush.bf16.msrb.mxu3 %v819_v2 }
  0x47   :  { %530 = vmatpush.bf16.msrb.mxu2 %v810_v3 }
  0x48   :  { %543 = vmatpush.bf16.msrb.mxu3 %v818_v4 }
  0x87   :  { %v122_v50 = vpop.f32.mrf.mxu1 }
  0x88   :  { %v123_v51 = vadd.f32 %v830_v49, %v122_v50 }
  0x8a   :  { %v127_v53 = vmul.f32 0.01, %v123_v51  ;;  %vm126_vm2 = vcmp.gt.f32.partialorder %v123_v51, 0.0 }
  0x8b   :  { %v90_v54 = vpop.f32.mrf.mxu0 }
  0x8c   :  { %v91_v55 = vadd.f32 %v831_v52, %v90_v54  ;;  %v128_v56 = vsel %vm126_vm2, %v123_v51, %v127_v53 }
  0x8d   :  { %v146_v57 = vpack.c.bf16 %v128_v56, %v128_v56 }
  0x8e   :  { %vm94_vm3 = vcmp.gt.f32.partialorder %v91_v55, 0.0  ;;  %v95_v58 = vmul.f32 0.01, %v91_v55 }
  0x8f   :  { %v124_v59 = vpop.f32.mrf.mxu1  ;;  %251 = vmatmul.bf16.vlgmr.msra.gmra.mxu2 %v146_v57  ;;  %264 = vmatmul.bf16.vlgmr.msra.gmra.mxu3 %v146_v57 }
  0x90   :  { %v96_v60 = vsel %vm94_vm3, %v91_v55, %v95_v58 }
  0x91   :  { %v129_v61 = vpack.c.bf16 %v96_v60, %v96_v60 }
  0x93   :  { %v92_v62 = vpop.f32.mrf.mxu0  ;;  %357 = vmatmul.bf16.vlgmr.msrb.gmra.mxu1 %v129_v61  ;;  %370 = vmatmul.bf16.vlgmr.msrb.gmra.mxu0 %v129_v61 }
 0x110   :  { %v358_v6 = vpop.f32.mrf.mxu1  ;;  %v371_v7 = vpop.f32.mrf.mxu0 }
 0x112   :  { %v252_v10 = vpop.f32.mrf.mxu2  ;;  %v265_v11 = vpop.f32.mrf.mxu3 }
 0x113   :  { %v359_v12 = vadd.f32 %v358_v6, %v252_v10  ;;  %v372_v13 = vadd.f32 %v371_v7, %v265_v11 }
 0x115   :  { %v381_v14 = vadd.f32 %v377_v8, %v359_v12  ;;  %v382_v15 = vadd.f32 %v378_v9, %v372_v13 }
 0x117   :  { %v385_v16 = vmul.f32 0.01, %v381_v14  ;;  %v386_v17 = vmul.f32 0.01, %v382_v15  ;;  %vm383_vm4 = vcmp.gt.f32.partialorder %v381_v14, 0.0  ;;  %vm384_vm5 = vcmp.gt.f32.partialorder %v382_v15, 0.0 }
 0x118   :  { %v360_v18 = vpop.f32.mrf.mxu1  ;;  %v373_v19 = vpop.f32.mrf.mxu0 }
 0x119   :  { %v387_v20 = vsel %vm383_vm4, %v381_v14, %v385_v16  ;;  %v388_v21 = vsel %vm384_vm5, %v382_v15, %v386_v17 }
 0x11a   :  { %v254_v22 = vpop.f32.mrf.mxu2  ;;  %v267_v23 = vpop.f32.mrf.mxu3  ;;  %v389_v24 = vpack.c.bf16 %v387_v20, %v387_v20  ;;  %v390_v25 = vpack.c.bf16 %v388_v21, %v388_v21 }
 0x11c   :  { %531 = vmatmul.bf16.vlgmr.msrb.gmra.mxu2 %v389_v24  ;;  %544 = vmatmul.bf16.vlgmr.msrb.gmra.mxu3 %v390_v25 }
 0x19f   :  { %v532_v27 = vpop.f32.mrf.mxu2  ;;  %v545_v28 = vpop.f32.mrf.mxu3 }
 0x1a0   :  { %v533_v29 = vadd.f32 %v832_v26, %v532_v27 }
 0x1a2   :  { %v546_v30 = vadd.f32 %v545_v28, %v533_v29 }
 0x1a4   :  { %833 = vtanh.f32 %v546_v30 }
 0x1a7   :  { %v534_v31 = vpop.f32.mrf.mxu2  ;;  %v547_v32 = vpop.f32.mrf.mxu3 }
 0x1aa   :  { %v834_v33 = vpop.eup %833 }
 0x1ab   :  { %551 = vst.msk [vmem:[#allocation5] sm:$0xff] %vm550_vm6, %v834_v33 }
 0x1ac   :  { %562 = dma.vmem_to_hbm [thread:$0]  %s558_s17, 128, %s560_s20, [#allocation4]  }
 0x1ad   :  { %885 = dma.done.wait [#allocation4], 128  }
 0x1ae   :  { %886 = vsyncadd [#allocation4], 4294967168 }
 0x1af   :  { %567 = vsyncpa [#allocation3], 1 }
 0x1b0   :  { %568 = vsyncpa [#allocation4], 1 }

</bundles_post_ra>
